<compile_context>
chip_gen: v5e
topology: v5e:2x2
jax: 0.10.0
libtpu: 0.0.40
codegen_flags: <defaults>
</compile_context>

<pallas_src>
import jax
import jax.numpy as jnp
from jax import lax
from jax.experimental import pallas as pl
from jax.experimental.pallas import tpu as pltpu

KSIZE = 7
PAD = KSIZE // 2
_STRIP = 8  # channels per accumulation strip (one f32 sublane group)


def _device_defaults():
    """(target streamed-block bytes, scoped VMEM limit) tuned per generation."""
    try:
        kind = jax.devices()[0].device_kind.lower()
    except Exception:
        kind = ""
    if ("v4" in kind) or ("v5" in kind) or ("v6" in kind):
        # 128 MiB physical VMEM: larger blocks + generous scoped limit.
        return 4 * 1024 * 1024, 96 * 1024 * 1024
    # v7x (64 MiB VMEM per TensorCore) and unknown devices: stay conservative.
    return 2 * 1024 * 1024, 32 * 1024 * 1024


def _normalize_c_tile(C, c_tile):
    """Clamp the channel tile to C or round it to a multiple of 8 sublanes."""
    c_tile = int(c_tile)
    if c_tile >= C or C <= _STRIP:
        return C
    return max(_STRIP, (c_tile // _STRIP) * _STRIP)


def _channel_reduce(x, c_tile, vmem_limit):
    """(N, C, H, W) -> (N, 2, H*W) f32 [channel-sum, channel-max] planes."""
    N, C, H, W = x.shape
    HW = H * W
    xf = x.reshape(N, C, HW)          # lane-dense stream even when W < 128
    n_c = pl.cdiv(C, c_tile)
    rem = C - (n_c - 1) * c_tile      # valid channels in the last grid step

    def kernel(x_ref, o_ref, sum_acc, max_acc):
        c_idx = pl.program_id(1)
        c_last = pl.num_programs(1) - 1

        @pl.when(c_idx == 0)
        def _init():
            sum_acc[...] = jnp.zeros_like(sum_acc)
            max_acc[...] = jnp.full_like(max_acc, -jnp.inf)

        def accumulate(nch):
            # nch is a Python int, so both the strip loop and the leftover
            # loop have static trip counts (no masking on the hot path).
            n_strips = nch // _STRIP
            if n_strips > 0:
                def strip(s, carry):
                    c0 = pl.multiple_of(s * _STRIP, _STRIP)
                    xs = x_ref[0, pl.ds(c0, _STRIP), :].astype(jnp.float32)
                    sum_acc[...] = sum_acc[...] + xs
                    max_acc[...] = jnp.maximum(max_acc[...], xs)
                    return carry
                lax.fori_loop(0, n_strips, strip, 0,
                              unroll=n_strips if n_strips <= 8 else 8)
            # TODO(synk): on v6e/v7x keep the running max in bf16 for bf16
            # inputs (cast only for the f32 sum) to halve max-path VALU work.
            for c in range(n_strips * _STRIP, nch):   # < 8 leftover channels
                xc = x_ref[0, c, :].astype(jnp.float32)
                sum_acc[0, :] = sum_acc[0, :] + xc
                max_acc[0, :] = jnp.maximum(max_acc[0, :], xc)

        if rem == c_tile:
            accumulate(c_tile)
        else:
            @pl.when(c_idx < c_last)
            def _full_tile():
                accumulate(c_tile)

            @pl.when(c_idx == c_last)
            def _tail_tile():
                accumulate(rem)

        @pl.when(c_idx == c_last)
        def _finalize():
            o_ref[0, 0, :] = jnp.sum(sum_acc[...], axis=0)
            o_ref[0, 1, :] = jnp.max(max_acc[...], axis=0)

    return pl.pallas_call(
        kernel,
        out_shape=jax.ShapeDtypeStruct((N, 2, HW), jnp.float32),
        grid=(N, n_c),
        in_specs=[pl.BlockSpec((1, c_tile, HW), lambda n, c: (n, c, 0))],
        out_specs=pl.BlockSpec((1, 2, HW), lambda n, c: (n, 0, 0)),
        scratch_shapes=[pltpu.VMEM((_STRIP, HW), jnp.float32),   # partial sums
                        pltpu.VMEM((_STRIP, HW), jnp.float32)],  # partial maxes
        compiler_params=pltpu.CompilerParams(
            dimension_semantics=("parallel", "arbitrary"),
            vmem_limit_bytes=vmem_limit),
        cost_estimate=pl.CostEstimate(
            flops=2 * N * C * HW,
            transcendentals=0,
            bytes_accessed=N * C * HW * x.dtype.itemsize + N * 2 * HW * 4),
    )(xf)


def _conv_kernel(p_ref, band_ref, o_ref, pad_ref):
    """7x7 conv (as banded-Toeplitz matmuls) + sigmoid for one batch element.

    p_ref   : (1, 2, H, W) f32   [sum, max] planes
    band_ref: (7, 2*Wc, W) f32   per-kh band (kw taps, 1/C, column pad folded in)
    o_ref   : (1, 1, H, W)       output block
    pad_ref : (H + 2*PAD, 2*Wc)  row-padded [sum | max] slab scratch
    """
    H, W = o_ref.shape[2], o_ref.shape[3]
    wc2 = pad_ref.shape[1]
    wc = wc2 // 2

    # Zero only what is not overwritten below: PAD border rows and lane-pad
    # columns.  Done every step (cheap) so it stays correct under megacore
    # splitting of the batch grid axis.
    pad_ref[0:PAD, :] = jnp.zeros((PAD, wc2), jnp.float32)
    pad_ref[PAD + H:PAD + H + PAD, :] = jnp.zeros((PAD, wc2), jnp.float32)
    if wc > W:
        pad_ref[PAD:PAD + H, W:wc] = jnp.zeros((H, wc - W), jnp.float32)
        pad_ref[PAD:PAD + H, wc + W:wc2] = jnp.zeros((H, wc - W), jnp.float32)

    # Interior planes land at lane offsets 0 and wc (a multiple of 128), so
    # both stores are lane-aligned (no column-offset masked stores).
    pad_ref[PAD:PAD + H, 0:W] = p_ref[0, 0]
    pad_ref[PAD:PAD + H, wc:wc + W] = p_ref[0, 1]

    # 7x7 conv: kh is a row shift of the padded slab; kw and the two input
    # planes are folded into one (2*wc, W) band -> 7 fused MXU matmuls.
    acc = jnp.zeros((H, W), jnp.float32)
    for kh in range(KSIZE):
        slab = pad_ref[kh:kh + H, :]                       # (H, 2*wc)
        acc = acc + jnp.dot(slab, band_ref[kh],
                            preferred_element_type=jnp.float32)
    o_ref[0, 0] = jax.nn.sigmoid(acc).astype(o_ref.dtype)


def _build_band(weight, C, W, Wc):
    """(1,2,7,7) OIHW conv weight -> (7, 2*Wc, W) banded matrices (f32).

    For each kh, rows [0, W) hold the avg-plane taps (pre-scaled by 1/C) and
    rows [Wc, Wc+W) the max-plane taps; the column zero-padding of the conv is
    folded into the band (off-band entries are zero), so the planes are
    consumed at lane offset 0 with no column padding.
    """
    w = weight[0].astype(jnp.float32)                 # (2, 7, 7)
    w = w.at[0].multiply(1.0 / C)                     # fold the mean's 1/C
    eyes = jnp.stack([jnp.eye(W, W, k=PAD - kw, dtype=jnp.float32)
                      for kw in range(KSIZE)], axis=0)            # (7, W, W)
    taps = jnp.einsum("chk,kqw->chqw", w, eyes)                   # (2, 7, W, W)
    band = jnp.zeros((KSIZE, 2 * Wc, W), jnp.float32)
    band = band.at[:, 0:W, :].set(taps[0])
    band = band.at[:, Wc:Wc + W, :].set(taps[1])
    return band


def _conv_sigmoid(planes, band, out_dtype, vmem_limit):
    N, _, H, W = planes.shape
    wc2 = band.shape[1]
    out_itemsize = jnp.dtype(out_dtype).itemsize
    return pl.pallas_call(
        _conv_kernel,
        out_shape=jax.ShapeDtypeStruct((N, 1, H, W), out_dtype),
        grid=(N,),
        in_specs=[
            pl.BlockSpec((1, 2, H, W), lambda n: (n, 0, 0, 0)),
            # Constant block index: Pallas does not re-fetch it between steps.
            pl.BlockSpec((KSIZE, wc2, W), lambda n: (0, 0, 0)),
        ],
        out_specs=pl.BlockSpec((1, 1, H, W), lambda n: (n, 0, 0, 0)),
        scratch_shapes=[pltpu.VMEM((H + 2 * PAD, wc2), jnp.float32)],
        compiler_params=pltpu.CompilerParams(
            dimension_semantics=("parallel",),
            vmem_limit_bytes=vmem_limit),
        cost_estimate=pl.CostEstimate(
            flops=2 * N * KSIZE * wc2 * H * W,
            transcendentals=N * H * W,
            bytes_accessed=(N * 2 * H * W * 4 + KSIZE * wc2 * W * 4
                            + N * H * W * out_itemsize)),
    )(planes, band)


def spatial_attention(x, weight, *, c_tile=None):
    """x: (N, C, H, W); weight: (1, 2, 7, 7) OIHW Conv2d(2,1,7,padding=3,bias=False)."""
    N, C, H, W = x.shape
    HW = H * W
    target_block_bytes, vmem_limit = _device_defaults()
    if c_tile is None:
        c_tile = max(1, target_block_bytes // max(1, HW * x.dtype.itemsize))
    c_tile = _normalize_c_tile(C, c_tile)

    # TODO(synk): tile the flattened H*W axis (a second 'parallel' grid dim)
    # for very large planes and to feed v7x's second TensorCore when N is small.
    planes = _channel_reduce(x, c_tile, vmem_limit)        # (N, 2, H*W) f32
    planes4 = planes.reshape(N, 2, H, W)                   # contiguous: free

    Wc = ((W + 127) // 128) * 128
    # TODO(synk): for very large W, tile the W axis of the band instead of one slab.
    band = _build_band(weight, C, W, Wc)                   # (7, 2*Wc, W) f32
    return _conv_sigmoid(planes4, band, x.dtype, vmem_limit)


def spatial_attention_reference(x, weight):
    """Pure-JAX reference matching the PyTorch module semantics."""
    avg = jnp.mean(x, axis=1, keepdims=True)
    mx = jnp.max(x, axis=1, keepdims=True)
    cat = jnp.concatenate([avg, mx], axis=1)               # (N, 2, H, W)
    conv = lax.conv_general_dilated(
        cat, weight,
        window_strides=(1, 1),
        padding=((PAD, PAD), (PAD, PAD)),
        dimension_numbers=("NCHW", "OIHW", "NCHW"),
        precision=lax.Precision.HIGHEST)
    return jax.nn.sigmoid(conv)


def _check(out, ref, name):
    assert out.shape == ref.shape, (name, out.shape, ref.shape)
    err = float(jnp.max(jnp.abs(out - ref)))
    assert jnp.allclose(out, ref, atol=1e-3, rtol=1e-3), (
        f"{name}: mismatch vs reference, max abs err = {err}")


if __name__ == "__main__":
    key = jax.random.PRNGKey(0)
    kx1, kx2, kw = jax.random.split(key, 3)

    # Conv2d(2, 1, 7, bias=False) default init: uniform(-1/sqrt(fan_in), ...).
    fan_in = 2 * KSIZE * KSIZE
    bound = 1.0 / (fan_in ** 0.5)
    weight = jax.random.uniform(kw, (1, 2, KSIZE, KSIZE), jnp.float32,
                                minval=-bound, maxval=bound)

    # Config 1: multi-step channel reduction (C=24 with c_tile=8 -> 3 reduction
    # steps exercising the accumulator / pl.when path) plus the auto-tile path.
    x1 = jax.random.normal(kx1, (2, 24, 16, 16), dtype=jnp.float32)
    ref1 = spatial_attention_reference(x1, weight)
    out1 = jax.block_until_ready(spatial_attention(x1, weight, c_tile=8))
    _check(out1, ref1, "C=24 c_tile=8")
    out1b = jax.block_until_ready(spatial_attention(x1, weight))
    _check(out1b, ref1, "C=24 auto tile")

    # Config 2: ragged channel count (13 % 8 != 0 -> masked-tail grid step and
    # per-channel leftovers) and H*W not a multiple of 128.
    x2 = jax.random.normal(kx2, (2, 13, 16, 20), dtype=jnp.float32)
    ref2 = spatial_attention_reference(x2, weight)
    out2 = jax.block_until_ready(spatial_attention(x2, weight, c_tile=8))
    _check(out2, ref2, "C=13 ragged")

    print("KERNEL_OK")
</pallas_src>

<mosaic_0001>
module attributes {stable_mosaic.version = 11 : i64} {
  func.func @kernel(%arg0: i32, %arg1: i32, %arg2: memref<1x8x256xf32, #tpu.memory_space<vmem>>, %arg3: memref<1x2x256xf32, #tpu.memory_space<vmem>>, %arg4: memref<8x256xf32, #tpu.memory_space<vmem>>, %arg5: memref<8x256xf32, #tpu.memory_space<vmem>>) attributes {dimension_semantics = [#tpu.dimension_semantics<parallel>, #tpu.dimension_semantics<arbitrary>], iteration_bounds = array<i64: 2, 3>, scalar_prefetch = 0 : i64, scratch_operands = 2 : i64, tpu.core_type = #tpu.core_type<tc>, window_params = [{transform_indices = @transform_0, window_bounds = array<i64: 1, 8, 256>}, {transform_indices = @transform_1, window_bounds = array<i64: 1, 2, 256>}]} {
    %c0_i32 = arith.constant 0 : i32
    %0 = arith.cmpi eq, %arg1, %c0_i32 : i32
    %1 = arith.extui %0 : i1 to i32
    %c0_i32_0 = arith.constant 0 : i32
    %2 = arith.cmpi ne, %1, %c0_i32_0 : i32
    scf.if %2 {
      %cst = arith.constant 0.000000e+00 : f32
      %17 = vector.broadcast %cst : f32 to vector<8x256xf32>
      %c0_12 = arith.constant 0 : index
      %c0_13 = arith.constant 0 : index
      %18 = vector.load %arg4[%c0_12, %c0_13] : memref<8x256xf32, #tpu.memory_space<vmem>>, vector<8x256xf32>
      tpu.vector_store %arg4[%c0_12, %c0_13], %17 {strides = array<i32>} : memref<8x256xf32, #tpu.memory_space<vmem>>, vector<8x256xf32>,
      %cst_14 = arith.constant 0xFF800000 : f32
      %19 = vector.broadcast %cst_14 : f32 to vector<8x256xf32>
      %c0_15 = arith.constant 0 : index
      %c0_16 = arith.constant 0 : index
      %20 = vector.load %arg5[%c0_15, %c0_16] : memref<8x256xf32, #tpu.memory_space<vmem>>, vector<8x256xf32>
      tpu.vector_store %arg5[%c0_15, %c0_16], %19 {strides = array<i32>} : memref<8x256xf32, #tpu.memory_space<vmem>>, vector<8x256xf32>,
    } else {
    }
    %c0_i32_1 = arith.constant 0 : i32
    %c8_i32 = arith.constant 8 : i32
    %3 = arith.muli %c0_i32_1, %c8_i32 : i32
    %4 = tpu.assume_multiple %3, 8 : i32
    %c0 = arith.constant 0 : index
    %5 = arith.index_cast %4 : i32 to index
    %c0_2 = arith.constant 0 : index
    %6 = vector.load %arg2[%c0, %5, %c0_2] : memref<1x8x256xf32, #tpu.memory_space<vmem>>, vector<1x8x256xf32>
    %7 = vector.shape_cast %6 : vector<1x8x256xf32> to vector<8x256xf32>
    %c0_3 = arith.constant 0 : index
    %c0_4 = arith.constant 0 : index
    %8 = vector.load %arg4[%c0_3, %c0_4] : memref<8x256xf32, #tpu.memory_space<vmem>>, vector<8x256xf32>
    %9 = arith.addf %8, %7 : vector<8x256xf32>
    %c0_5 = arith.constant 0 : index
    %c0_6 = arith.constant 0 : index
    %10 = vector.load %arg4[%c0_5, %c0_6] : memref<8x256xf32, #tpu.memory_space<vmem>>, vector<8x256xf32>
    tpu.vector_store %arg4[%c0_5, %c0_6], %9 {strides = array<i32>} : memref<8x256xf32, #tpu.memory_space<vmem>>, vector<8x256xf32>,
    %c0_7 = arith.constant 0 : index
    %c0_8 = arith.constant 0 : index
    %11 = vector.load %arg5[%c0_7, %c0_8] : memref<8x256xf32, #tpu.memory_space<vmem>>, vector<8x256xf32>
    %12 = arith.maximumf %11, %7 : vector<8x256xf32>
    %c0_9 = arith.constant 0 : index
    %c0_10 = arith.constant 0 : index
    %13 = vector.load %arg5[%c0_9, %c0_10] : memref<8x256xf32, #tpu.memory_space<vmem>>, vector<8x256xf32>
    tpu.vector_store %arg5[%c0_9, %c0_10], %12 {strides = array<i32>} : memref<8x256xf32, #tpu.memory_space<vmem>>, vector<8x256xf32>,
    %c1_i32 = arith.constant 1 : i32
    %c2_i32 = arith.constant 2 : i32
    %14 = arith.cmpi eq, %arg1, %c2_i32 : i32
    %15 = arith.extui %14 : i1 to i32
    %c0_i32_11 = arith.constant 0 : i32
    %16 = arith.cmpi ne, %15, %c0_i32_11 : i32
    scf.if %16 {
      %c0_12 = arith.constant 0 : index
      %c0_13 = arith.constant 0 : index
      %17 = vector.load %arg4[%c0_12, %c0_13] : memref<8x256xf32, #tpu.memory_space<vmem>>, vector<8x256xf32>
      %cst = arith.constant dense<0.000000e+00> : vector<256xf32>
      %18 = vector.multi_reduction <add>, %17, %cst [0] : vector<8x256xf32> to vector<256xf32>
      %c0_14 = arith.constant 0 : index
      %c0_15 = arith.constant 0 : index
      %c0_16 = arith.constant 0 : index
      %19 = vector.load %arg3[%c0_14, %c0_15, %c0_16] : memref<1x2x256xf32, #tpu.memory_space<vmem>>, vector<1x1x256xf32>
      %20 = vector.shape_cast %19 : vector<1x1x256xf32> to vector<256xf32>
      %21 = vector.shape_cast %18 : vector<256xf32> to vector<1x1x256xf32>
      tpu.vector_store %arg3[%c0_14, %c0_15, %c0_16], %21 {strides = array<i32>} : memref<1x2x256xf32, #tpu.memory_space<vmem>>, vector<1x1x256xf32>,
      %c0_17 = arith.constant 0 : index
      %c0_18 = arith.constant 0 : index
      %22 = vector.load %arg5[%c0_17, %c0_18] : memref<8x256xf32, #tpu.memory_space<vmem>>, vector<8x256xf32>
      %cst_19 = arith.constant dense<0xFF800000> : vector<256xf32>
      %23 = vector.multi_reduction <maximumf>, %22, %cst_19 [0] : vector<8x256xf32> to vector<256xf32>
      %c0_20 = arith.constant 0 : index
      %c1 = arith.constant 1 : index
      %c0_21 = arith.constant 0 : index
      %24 = vector.load %arg3[%c0_20, %c1, %c0_21] : memref<1x2x256xf32, #tpu.memory_space<vmem>>, vector<1x1x256xf32>
      %25 = vector.shape_cast %24 : vector<1x1x256xf32> to vector<256xf32>
      %26 = vector.shape_cast %23 : vector<256xf32> to vector<1x1x256xf32>
      tpu.vector_store %arg3[%c0_20, %c1, %c0_21], %26 {strides = array<i32>} : memref<1x2x256xf32, #tpu.memory_space<vmem>>, vector<1x1x256xf32>,
    } else {
    }
    return
  }
  func.func @transform_0(%arg0: i32, %arg1: i32) -> (i32, i32, i32) {
    %c0_i32 = arith.constant 0 : i32
    %c0_i32_0 = arith.constant 0 : i32
    return %arg0, %arg1, %c0_i32 : i32, i32, i32
  }
  func.func @transform_1(%arg0: i32, %arg1: i32) -> (i32, i32, i32) {
    %c0_i32 = arith.constant 0 : i32
    %c0_i32_0 = arith.constant 0 : i32
    %c0_i32_1 = arith.constant 0 : i32
    return %arg0, %c0_i32, %c0_i32_0 : i32, i32, i32
  }
}

</mosaic_0001>

<bundles_post_ra>
// kernel: tpu_custom_call.1
= control target key start
LH: loop header
LB: loop body
LE: loop exit
PB: predicated region body
PF: predicated region fallthrough
CT: control target
= control target key end

     0   :  { %6 = vsyncpa [#allocation5], 0  ;;  %s794_s0 = inlined_call_operand.hbm [shape: f32[2,24,256], index: 0, kind: input, shape index: {}]   ;;  %s795_s1 = inlined_call_operand.hbm [shape: f32[2,2,256], index: 1, kind: output, shape index: {}]  }
   0x1   :  { %8 = vsyncpa [#allocation5 + $0x1], 0 }
   0x2   :  { %9 = vsyncpa [#allocation6], 0 }
   0x3   :  { %11 = vsyncpa [#allocation6 + $0x1], 0  ;;  %s617_s6 = smov 0   ;;  %s619_s7 = smov 0  }
   0x4   :  { %s621_s8 = smov 0   ;;  %s623_s9 = smov 0  }
   0x5   :  { %s625_s10 = smov 0   ;;  %s627_s11 = smov 0  }
   0x6   :  { %s629_s12 = smov 0   ;;  %s631_s13 = smov 0  }
   0x7   :  { %s633_s14 = smov 0   ;;  %s635_s15 = smov 0  }
   0x8   :  { %s637_s16 = smov 0  }
   0x9 LB: > { %799 = sst [smem:[#allocation10_spill]] %s599_s15  ;;  %s327_s17 = sadd.s32 4294967295, %s603_s16   ;;  %s603_s16 = sphi %s637_s16, %s17_s16   ;;  %s599_s15 = sphi %s635_s15, %s808_s15   ;;  %s595_s14 = sphi %s633_s14, %s816_s14   ;;  %s591_s13 = sphi %s631_s13, %s806_s13   ;;  %s587_s12 = sphi %s629_s12, %s815_s12   ;;  %s583_s11 = sphi %s627_s11, %s814_s11   ;;  %s579_s10 = sphi %s625_s10, %s813_s10   ;;  %s575_s9 = sphi %s623_s9, %s812_s9   ;;  %s571_s8 = sphi %s621_s8, %s811_s8   ;;  %s567_s7 = sphi %s619_s7, %s810_s7   ;;  %s563_s6 = sphi %s617_s6, %s809_s6  }
   0xa   : > { %s328_s18 = sadd.s32 4294967294, %s603_s16   ;;  %s26_s19 = sadd.s32 1, %s595_s14 }
   0xb   : > { %s29_s20 = sadd.s32 1, %s599_s15  ;;  %p27_p0 = scmp.ge.s32.totalorder %s26_s19, 3 }
   0xc   : > { %s38_s21 = sadd.s32 1, %s583_s11  ;;  %p45_p1 = scmp.ne.s32.totalorder %s583_s11, %s579_s10 }
   0xd   : > { %p46_p2 = scmp.eq.s32.totalorder %s603_s16, 0  ;;  %s818_s19 = smov (%p27_p0, %s26_s19), 0 }
   0xe   : > { %800 = sst [smem:[#allocation11_spill]] %s818_s19  ;;  %s820_s20 = smov (!%p27_p0, %s29_s20), %s599_s15 }
   0xf   : > { %s34_s22 = ssub.s32 %s595_s14, %s818_s19  ;;  %p683_p3 = por %p46_p2, %p45_p1 }
  0x10   : > { %p31_p4 = scmp.ge.s32.totalorder %s820_s20, 2  ;;  %p51_p5 = scmp.ne.s32.totalorder %s579_s10, %s575_s9 }
  0x11   : > { %p52_p6 = scmp.eq.s32.totalorder %s327_s17, 0  ;;  %s64_s24 = sadd.s32 1, %s571_s8 }
  0x12   : > { %s822_s20 = smov (%p31_p4, %s820_s20), 0  ;;  %p74_p8 = scmp.ne.s32.totalorder %s571_s8, %s567_s7 }
  0x13   : > { %802 = sst [smem:[#allocation12_spill]] %s822_s20  ;;  %p691_p7 = por %p52_p6, %p51_p5 }
  0x14   : > { %s33_s26 = ssub.s32 %s599_s15, %s822_s20  ;;  %p75_p9 = scmp.eq.s32.totalorder %s327_s17, 5 }
  0x15   : > { %s35_s27 = sor.u32 %s34_s22, %s33_s26  ;;  %p62_p10 = scmp.eq.s32.totalorder %s33_s26, 0 }
  0x16   : > { %p36_p11 = scmp.eq.s32.totalorder %s35_s27, 0  ;;  %p699_p12 = por %p75_p9, %p74_p8 }
  0x17   : > { %s704_s29 = scalar_select %p62_p10, %s571_s8, %s64_s24  }
  0x18   : > { %s707_s30 = scalar_select %p36_p11, %s583_s11, %s38_s21  }
  0x19   : > { %p80_p13 = scmp.ne.s32.totalorder %s567_s7, %s563_s6  ;;  %p81_p0 = scmp.eq.s32.totalorder %s328_s18, 5 }
  0x1a   : > { %p359_p1 = scmp.lt.s32.totalorder %s603_s16, 6  ;;  %s101_s3 = sand.u32 1, %s583_s11  }
  0x1b   : > { %p712_p2 = por %p81_p0, %p80_p13  ;;  %s331_s4 = sshll.u32 %s101_s3, 4 }
  0x1c   : > { %s332_s5 = sshll.u32 %s595_s14, 1  ;;  %s346_s9 = smul.u32 6, %s599_s15 }
  0x1d   : > { %s105_s17 = scalar_lea.vmem [#allocation4], %s331_s4  ;;  %p352_p4 = pnand %p359_p1, %p683_p3 }
  0x1e   : > { %s116_s22 = sshll.u32 %s105_s17, 4  ;;  %s110_s24 = sadd.s32 %s346_s9, %s332_s5  ;;  %s117_s22 = int_to_ptr.vmem [resolvable:$true] %s116_s22 }
  0x1f   : > { %p334_p5 = scmp.ge.s32.totalorder %s603_s16, 1  ;;  %s333_s21 = sshll.u32 %s110_s24, 3 }
  0x20   : > { %s112_s18 = scalar_lea.hbm %s794_s0, %s333_s21  ;;  %p121_p6 = scmp.lt.s32.totalorder %s603_s16, 7 }
  0x21   : > { %s114_s20 = sshll.u32 %s112_s18, 4  ;;  %s102_s19 = scalar_lea.sflag [#allocation5], %s101_s3  ;;  %s115_s20 = int_to_ptr.hbm [resolvable:$true] %s114_s20 }
  0x22   : > { %p122_p8 = pnand %p334_p5, %p121_p6 }
  0x23   : > { %354 = dma.hbm_to_vmem [thread:$0]  (!%p352_p4), %s115_s20, 256, %s117_s22, %s102_s19  }
  0x24   : > { %125 = sbr.rel (%p122_p8) target bundleno = 102 (0x66), region = 24  ;;  %s127_s4 = sand.u32 (!%p122_p8), 1, %s579_s10  }
  0x25   : > { %s335_s17 = sshll.u32 (!%p122_p8), %s127_s4, 4  ;;  %s128_s23 = scalar_lea.sflag (!%p122_p8), [#allocation5], %s127_s4 }
  0x26   : > { %s131_s15 = scalar_lea.vmem (!%p122_p8), [#allocation4], %s335_s17 }
  0x29   : > { %554 = dma.done.wait (%p691_p7), %s128_s23, 256  }
  0x2a   : > { %556 = vsyncadd (%p691_p7), %s128_s23, 4294967040  ;;  %s148_s5 = sand.u32 1, %s567_s7   ;;  %p337_p3 = scmp.ne.s32.totalorder %s587_s12, 0 }
  0x2b   : > { %s336_s9 = sshll.u32 %s148_s5, 2 }
  0x2c   : > { %s734_s24 = scalar_lea.vmem [#allocation7], %s336_s9  ;;  %154 = sbr.rel (%p337_p3) target bundleno = 54 (0x36), region = 32 }
  0x31   : > { %v605_v0 = vmov 0.0   ;;  %v606_v1 = vmov -inf  }
  0x32   : > { %155 = vst [vmem:[#allocation2] sm:$0xff] %v605_v0 }
  0x33   : > { %156 = vst [vmem:[#allocation2 + $0x8] sm:$0xff] %v605_v0 }
  0x34   : > { %157 = vst [vmem:[#allocation3 + $0x8] sm:$0xff] %v606_v1 }
  0x35   : > { %158 = vst [vmem:[#allocation3] sm:$0xff] %v606_v1 }
  0x36 PF: > { %v162_v2 = vld [vmem:[%s131_s15] sm:$0xff]  ;;  %v163_v4 = vld [vmem:[%s131_s15 + $0x8] sm:$0xff]  ;;  %p338_p7 = scmp.ne.s32.totalorder %s587_s12, 2 }
  0x39   : > { %v164_v3 = vld [vmem:[#allocation2] sm:$0xff] }
  0x3a   : > { %v166_v5 = vadd.f32 %v164_v3, %v162_v2  ;;  %v165_v6 = vld [vmem:[#allocation2 + $0x8] sm:$0xff] }
  0x3b   : > { %v170_v7 = vld [vmem:[#allocation3 + $0x8] sm:$0xff]  ;;  %v167_v9 = vadd.f32 %v165_v6, %v163_v4  ;;  %179 = sbr.rel (%p338_p7) target bundleno = 87 (0x57), region = 36 }
  0x3c   : > { %v171_v8 = vld [vmem:[#allocation3] sm:$0xff]  ;;  %v172_v10 = vmax.f32 %v170_v7, %v162_v2  ;;  %168 = vst [vmem:[#allocation2] sm:$0xff] %v166_v5 }
  0x3d   : > { %v173_v11 = vmax.f32 %v171_v8, %v163_v4  ;;  %169 = vst [vmem:[#allocation2 + $0x8] sm:$0xff] %v167_v9 }
  0x3e   : > { %174 = vst [vmem:[#allocation3 + $0x8] sm:$0xff] %v172_v10 }
  0x3f   : > { %175 = vst [vmem:[#allocation3] sm:$0xff] %v173_v11 }
  0x40   : > { %v200_v34 = vlaneseq  ;;  %vm197_vm0 = vcmask 1040384  }
  0x42   : > { %vm202_vm1 = vcmp.lt.s32.totalorder %v200_v34, 256 }
  0x43   : > { %v180_v12 = vld [vmem:[#allocation2] sm:$0xff] }
  0x44   : > { %v181_v13 = vld [vmem:[#allocation2 + $0x8] sm:$0xff]  ;;  %v182_v15 = vrot.slane %v180_v12, 4 }
  0x45   : > { %v205_v14 = vld [vmem:[#allocation3 + $0x8] sm:$0xff]  ;;  %v188_v16 = vrot.slane %v181_v13, 4 }
  0x46   : > { %v206_v17 = vld [vmem:[#allocation3] sm:$0xff]  ;;  %v207_v18 = vrot.slane %v205_v14, 4  ;;  %v183_v20 = vadd.f32 %v182_v15, %v180_v12 }
  0x47   : > { %v213_v19 = vrot.slane %v206_v17, 4  ;;  %v189_v21 = vadd.f32 %v188_v16, %v181_v13 }
  0x48   : > { %v208_v22 = vmax.f32 %v205_v14, %v207_v18  ;;  %v184_v24 = vrot.slane %v183_v20, 2 }
  0x49   : > { %v214_v23 = vmax.f32 %v206_v17, %v213_v19  ;;  %v190_v25 = vrot.slane %v189_v21, 2 }
  0x4a   : > { %v209_v26 = vrot.slane %v208_v22, 2  ;;  %v185_v28 = vadd.f32 %v184_v24, %v183_v20 }
  0x4b   : > { %v215_v27 = vrot.slane %v214_v23, 2  ;;  %v191_v29 = vadd.f32 %v190_v25, %v189_v21 }
  0x4c   : > { %v210_v30 = vmax.f32 %v208_v22, %v209_v26  ;;  %v186_v32 = vrot.slane %v185_v28, 1 }
  0x4d   : > { %v216_v31 = vmax.f32 %v214_v23, %v215_v27  ;;  %v192_v33 = vrot.slane %v191_v29, 1 }
  0x4e   : > { %v211_v35 = vrot.slane %v210_v30, 1  ;;  %v187_v37 = vadd.f32 %v186_v32, %v185_v28 }
  0x4f   : > { %v217_v36 = vrot.slane %v216_v31, 1  ;;  %v193_v38 = vadd.f32 %v192_v33, %v191_v29 }
  0x50   : > { %v212_v39 = vmax.f32 %v210_v30, %v211_v35 }
  0x51   : > { %v218_v40 = vmax.f32 %v216_v31, %v217_v36  ;;  %v196_v41 = vrot.slane %v193_v38, 7 }
  0x53   : > { %v221_v42 = vrot.slane %v218_v40, 7  ;;  %v198_v43 = vsel %vm197_vm0, %v187_v37, %v196_v41 }
  0x54   : > { %204 = vst.msk [vmem:[%s734_s24] ss:$2 sm:$0x3] %vm202_vm1, %v198_v43 }
  0x55   : > { %v222_v44 = vsel %vm197_vm0, %v212_v39, %v221_v42 }
  0x56   : > { %339 = vst.msk [vmem:[%s734_s24 + $0x1] ss:$2 sm:$0x3] %vm202_vm1, %v222_v44 }
  0x57 PF: > { %s345_s12 = sshll.u32 %s591_s13, 2  ;;  %s240_s25 = sshll.u32 %s734_s24, 4  ;;  %s241_s25 = int_to_ptr.vmem [resolvable:$true] %s240_s25 }
  0x58   : > { %s238_s20 = scalar_lea.hbm %s795_s1, %s345_s12  ;;  %s227_s22 = scalar_lea.sflag [#allocation6], %s148_s5 }
  0x59   : > { %s242_s3 = sshll.u32 %s238_s20, 4  ;;  %s501_s13 = scalar_lea.hbm %s795_s1, 8  ;;  %s243_s3 = int_to_ptr.hbm [resolvable:$true] %s242_s3 }
  0x5a   : > { %s495_s21 = sshra.s32 %s243_s3, 4  ;;  %s496_s21 = int_to_ptr.hbm [resolvable:$true] %s495_s21 }
  0x5b   : > { %s497_s26 = scalar_lea.hbm %s496_s21, 4  ;;  %p502_p13 = scmp.lt.s32.totalorder %s496_s21, %s795_s1 }
  0x5c   : > { %p498_p9 = scmp.ne.s32.totalorder %s496_s21, %s497_s26  ;;  %p503_p0 = scmp.lt.s32.totalorder %s501_s13, %s497_s26 }
  0x5e   : > { %p499_p10 = pnand %p498_p9, %p699_p12  ;;  %p504_p1 = por %p503_p0, %p502_p13 }
  0x60   : > { %p500_p11 = pneg %p499_p10 }
  0x62   : > { %p505_p4 = pnand %p504_p1, %p500_p11 }
  0x64   : > { %508 = shalt.err (!%p505_p4)
}
  0x65   : > { %349 = dma.vmem_to_hbm [thread:$0]  (%p699_p12), %s241_s25, 64, %s243_s3, %s227_s22  }
  0x66 PF: > { %p360_p5 = scmp.ge.s32.totalorder %s603_s16, 2  ;;  %s254_s23 = sand.u32 1, %s563_s6  }
  0x67   : > { %s255_s5 = scalar_lea.sflag [#allocation6], %s254_s23 }
  0x68   : > { %p356_p6 = pnand %p360_p5, %p712_p2 }
  0x6a   : > { %p357_p8 = pneg %p356_p6 }
  0x6c   : > { %558 = dma.done.wait (%p357_p8), %s255_s5, 64  }
  0x6d   : > { %560 = vsyncadd (%p357_p8), %s255_s5, 4294967232  ;;  %s17_s16 = sadd.s32 1, %s603_s16   ;;  %s806_s13 = sld [smem:[#allocation10_spill]] }
  0x6e   : > { %p14_p3 = scmp.ge.s32.totalorder %s17_s16, 8   ;;  %s807_s28 = sld [smem:[#allocation11_spill]] }
  0x6f   : > { %s808_s15 = sld [smem:[#allocation12_spill]]  ;;  %s809_s6 = smov %s567_s7 }
  0x70   : > { %s810_s7 = smov %s571_s8  ;;  %s811_s8 = smov %s704_s29 }
  0x71   : > { %s812_s9 = smov %s579_s10  ;;  %s813_s10 = smov %s583_s11 }
  0x72   : > { %s814_s11 = smov %s707_s30  ;;  %s815_s12 = smov %s595_s14 }
  0x73   :  { %16 = sbr.rel (!%p14_p3) target bundleno = 9 (0x9), region = 79 }
  0x74   : > { %s816_s14 = smov %s807_s28 }
  0x78   :  { %261 = vsyncpa [#allocation5], 1 }
  0x79   :  { %263 = vsyncpa [#allocation5 + $0x1], 1 }
  0x7a   :  { %264 = vsyncpa [#allocation6], 1 }
  0x7b   :  { %266 = vsyncpa [#allocation6 + $0x1], 1 }

</bundles_post_ra>
